<compile_context>
chip_gen: v7x
topology: tpu7x:2x2x1
jax: 0.10.0
libtpu: 0.0.40
codegen_flags: <defaults>
</compile_context>

<pallas_src>
import math

import jax
import jax.numpy as jnp
from jax.experimental import pallas as pl
from jax.experimental.pallas import tpu as pltpu


def _round_up(x: int, m: int) -> int:
    return ((x + m - 1) // m) * m


def _cached_logits_kernel(x_ref, w_ref, b_ref, o_ref, logit_scr, m_scr, l_scr):
    # x_ref: (tm, D) bf16, w_ref: (D, tv) bf16, b_ref: (1, tv) f32, o_ref: (tm, tv)
    # logit_scr: (n_vtiles, tm, tv) f32;  m_scr / l_scr: (tm, 1) f32 running max / sum-exp
    p = pl.program_id(1)   # 0: compute + stats pass, 1: write pass
    j = pl.program_id(2)   # vocab tile index

    @pl.when(jnp.logical_and(p == 0, j == 0))
    def _init():
        m_scr[...] = jnp.full_like(m_scr, -jnp.inf)
        l_scr[...] = jnp.zeros_like(l_scr)

    @pl.when(p == 0)
    def _compute_and_stats():
        # MXU matmul in bf16, f32 accumulation; everything after stays in f32.
        logits = jnp.dot(x_ref[...], w_ref[...],
                         preferred_element_type=jnp.float32) + b_ref[...]
        logit_scr[j] = logits                      # cache: no recompute in pass 1
        m_prev = m_scr[...]
        m_new = jnp.maximum(m_prev, jnp.max(logits, axis=-1, keepdims=True))
        l_scr[...] = (l_scr[...] * jnp.exp(m_prev - m_new)
                      + jnp.sum(jnp.exp(logits - m_new), axis=-1, keepdims=True))
        m_scr[...] = m_new

    @pl.when(p == 1)
    def _write():
        lse = m_scr[...] + jnp.log(l_scr[...])
        o_ref[...] = (logit_scr[j] - lse).astype(o_ref.dtype)


def _recompute_kernel(x_ref, w_ref, b_ref, o_ref, m_scr, l_scr):
    # Fallback for vocab too large to cache a (tm, v_pad) f32 row block in VMEM.
    p = pl.program_id(1)
    j = pl.program_id(2)

    logits = jnp.dot(x_ref[...], w_ref[...],
                     preferred_element_type=jnp.float32) + b_ref[...]

    @pl.when(jnp.logical_and(p == 0, j == 0))
    def _init():
        m_scr[...] = jnp.full_like(m_scr, -jnp.inf)
        l_scr[...] = jnp.zeros_like(l_scr)

    @pl.when(p == 0)
    def _stats():
        m_prev = m_scr[...]
        m_new = jnp.maximum(m_prev, jnp.max(logits, axis=-1, keepdims=True))
        l_scr[...] = (l_scr[...] * jnp.exp(m_prev - m_new)
                      + jnp.sum(jnp.exp(logits - m_new), axis=-1, keepdims=True))
        m_scr[...] = m_new

    @pl.when(p == 1)
    def _write():
        lse = m_scr[...] + jnp.log(l_scr[...])
        o_ref[...] = (logits - lse).astype(o_ref.dtype)


def generator_forward(x, w, b, *, tm=256, tv=1024, out_dtype=jnp.float32,
                      cache_logits=None, cache_vmem_budget=40 * 1024 * 1024):
    """x: [batch, seq, d_model]; w: [d_model, vocab]; b: [vocab] -> [batch, seq, vocab]."""
    batch, seq, d_model = x.shape
    vocab = w.shape[1]
    M = batch * seq

    # Tile sizes: bf16 operands need (16, 128)-aligned blocks; clamp to the padded problem.
    tm = max(16, _round_up(min(tm, _round_up(M, 16)), 16))
    tv = max(128, _round_up(min(tv, _round_up(vocab, 128)), 128))
    m_pad = _round_up(M, tm)
    v_pad = _round_up(vocab, tv)
    n_vt = v_pad // tv

    x2 = x.reshape(M, d_model).astype(jnp.bfloat16)
    if m_pad != M:
        x2 = jnp.pad(x2, ((0, m_pad - M), (0, 0)))
    w2 = w.astype(jnp.bfloat16)
    b2 = b.reshape(1, vocab).astype(jnp.float32)
    if v_pad != vocab:
        w2 = jnp.pad(w2, ((0, 0), (0, v_pad - vocab)))
        # Padded vocab columns get a huge negative bias so exp() contributes 0 to the lse.
        b2 = jnp.pad(b2, ((0, 0), (0, v_pad - vocab)),
                     constant_values=float(jnp.finfo(jnp.float32).min))

    out_itemsize = jnp.dtype(out_dtype).itemsize
    # Double-buffered pipeline blocks (inputs + output) + persistent scratch.
    block_bytes = 2 * (tm * d_model * 2          # x tile (bf16)
                       + d_model * tv * 2        # weight tile (bf16)
                       + tv * 4                  # bias tile (f32)
                       + tm * tv * out_itemsize)  # output tile
    small_scratch = 2 * tm * 4                   # running max + running sum-of-exp
    cache_bytes = n_vt * tm * tv * 4             # cached logits row block (f32)
    cached_total = block_bytes + small_scratch + cache_bytes
    recompute_total = block_bytes + small_scratch

    if cache_logits is None:
        cache_logits = cached_total <= cache_vmem_budget

    grid = (m_pad // tm, 2, n_vt)

    if cache_logits:
        kernel = _cached_logits_kernel
        scratch = [pltpu.VMEM((n_vt, tm, tv), jnp.float32),
                   pltpu.VMEM((tm, 1), jnp.float32),
                   pltpu.VMEM((tm, 1), jnp.float32)]
        # Park the weight/bias windows on tile 0 during the write pass so the weight is
        # DMA'd from HBM exactly once per row tile.
        w_map = lambda i, p, j: (0, j * (1 - p))
        b_map = lambda i, p, j: (0, j * (1 - p))
        vmem_est = cached_total
    else:
        kernel = _recompute_kernel
        scratch = [pltpu.VMEM((tm, 1), jnp.float32),
                   pltpu.VMEM((tm, 1), jnp.float32)]
        w_map = lambda i, p, j: (0, j)
        b_map = lambda i, p, j: (0, j)
        vmem_est = recompute_total

    vmem_limit = min(64 * 1024 * 1024, int(vmem_est) + 8 * 1024 * 1024)

    out = pl.pallas_call(
        kernel,
        out_shape=jax.ShapeDtypeStruct((m_pad, v_pad), out_dtype),
        grid_spec=pltpu.PrefetchScalarGridSpec(
            num_scalar_prefetch=0,
            grid=grid,
            in_specs=[
                pl.BlockSpec((tm, d_model), lambda i, p, j: (i, 0)),   # x row tile
                pl.BlockSpec((d_model, tv), w_map),                    # weight vocab tile
                pl.BlockSpec((1, tv), b_map),                          # bias vocab tile
            ],
            # During the stats pass (p == 0) the output block is parked on (i, 0); it is
            # only filled (and flushed) during the write pass (p == 1).
            out_specs=pl.BlockSpec((tm, tv), lambda i, p, j: (i, j * p)),
            scratch_shapes=scratch,
        ),
        compiler_params=pltpu.CompilerParams(
            dimension_semantics=("parallel", "arbitrary", "arbitrary"),
            vmem_limit_bytes=int(vmem_limit),
        ),
    )(x2, w2, b2)

    return out[:M, :vocab].reshape(batch, seq, vocab)


def reference_forward_bf16(x, w, b):
    # Matches the kernel's bf16-on-MXU / f32-accumulate numerics.
    xf = x.astype(jnp.bfloat16).astype(jnp.float32)
    wf = w.astype(jnp.bfloat16).astype(jnp.float32)
    logits = jnp.einsum("bsd,dv->bsv", xf, wf) + b.astype(jnp.float32)
    return jax.nn.log_softmax(logits, axis=-1)


def reference_forward_f32(x, w, b):
    logits = jnp.einsum("bsd,dv->bsv", x, w, precision=jax.lax.Precision.HIGHEST) + b
    return jax.nn.log_softmax(logits, axis=-1)


if __name__ == "__main__":
    key = jax.random.PRNGKey(0)

    # Case 1: small, aligned shapes (cached-logits fast path).
    batch, seq, d_model, vocab = 2, 8, 32, 128
    kx, kw, kb = jax.random.split(key, 3)
    x = jax.random.normal(kx, (batch, seq, d_model), dtype=jnp.float32)
    bound = 1.0 / math.sqrt(d_model)   # PyTorch nn.Linear init range
    w = jax.random.uniform(kw, (d_model, vocab), minval=-bound, maxval=bound, dtype=jnp.float32)
    b = jax.random.uniform(kb, (vocab,), minval=-bound, maxval=bound, dtype=jnp.float32)

    out = generator_forward(x, w, b)
    jax.block_until_ready(out)
    assert out.shape == (batch, seq, vocab)
    ref = reference_forward_bf16(x, w, b)
    assert jnp.allclose(out, ref, atol=1e-3, rtol=1e-3), "mismatch vs bf16-consistent reference"
    ref32 = reference_forward_f32(x, w, b)
    assert float(jnp.max(jnp.abs(out - ref32))) < 5e-2, "mismatch vs f32 reference"

    # Case 1b: force the large-vocab recompute fallback path; must match the cached path.
    out_rc = generator_forward(x, w, b, cache_logits=False)
    jax.block_until_ready(out_rc)
    assert jnp.allclose(out_rc, ref, atol=1e-3, rtol=1e-3), "recompute path mismatch vs ref"
    assert jnp.allclose(out_rc, out, atol=1e-5, rtol=1e-5), "recompute path mismatch vs cached"

    # Case 2: ragged shapes (exercise M / vocab padding and the multi-tile online lse).
    batch2, seq2, d_model2, vocab2 = 1, 5, 32, 200
    kx2, kw2, kb2 = jax.random.split(jax.random.PRNGKey(1), 3)
    x_r = jax.random.normal(kx2, (batch2, seq2, d_model2), dtype=jnp.float32)
    bound2 = 1.0 / math.sqrt(d_model2)
    w_r = jax.random.uniform(kw2, (d_model2, vocab2), minval=-bound2, maxval=bound2,
                             dtype=jnp.float32)
    b_r = jax.random.uniform(kb2, (vocab2,), minval=-bound2, maxval=bound2, dtype=jnp.float32)

    ref_r = reference_forward_bf16(x_r, w_r, b_r)
    for force in (None, False):   # cached path and recompute path
        out_r = generator_forward(x_r, w_r, b_r, tm=16, tv=128, cache_logits=force)
        jax.block_until_ready(out_r)
        assert out_r.shape == (batch2, seq2, vocab2)
        assert jnp.allclose(out_r, ref_r, atol=1e-3, rtol=1e-3), "mismatch (ragged) vs reference"

    print("KERNEL_OK")
</pallas_src>

<mosaic_0001>
module attributes {stable_mosaic.version = 11 : i64} {
  func.func @_cached_logits_kernel(%arg0: i32, %arg1: i32, %arg2: i32, %arg3: memref<16x32xbf16, #tpu.memory_space<vmem>>, %arg4: memref<32x128xbf16, #tpu.memory_space<vmem>>, %arg5: memref<1x128xf32, #tpu.memory_space<vmem>>, %arg6: memref<16x128xf32, #tpu.memory_space<vmem>>, %arg7: memref<1x16x128xf32, #tpu.memory_space<vmem>>, %arg8: memref<16x1xf32, #tpu.memory_space<vmem>>, %arg9: memref<16x1xf32, #tpu.memory_space<vmem>>) attributes {dimension_semantics = [#tpu.dimension_semantics<parallel>, #tpu.dimension_semantics<arbitrary>, #tpu.dimension_semantics<arbitrary>], iteration_bounds = array<i64: 1, 2, 1>, scalar_prefetch = 0 : i64, scratch_operands = 3 : i64, tpu.core_type = #tpu.core_type<tc>, window_params = [{transform_indices = @transform_0, window_bounds = array<i64: 16, 32>}, {transform_indices = @transform_1, window_bounds = array<i64: 32, 128>}, {transform_indices = @transform_2, window_bounds = array<i64: 1, 128>}, {transform_indices = @transform_3, window_bounds = array<i64: 16, 128>}]} {
    %c0_i32 = arith.constant 0 : i32
    %0 = arith.cmpi eq, %arg1, %c0_i32 : i32
    %c0_i32_0 = arith.constant 0 : i32
    %1 = arith.cmpi eq, %arg2, %c0_i32_0 : i32
    %2 = arith.andi %0, %1 : i1
    %3 = arith.extui %2 : i1 to i32
    %c0_i32_1 = arith.constant 0 : i32
    %4 = arith.cmpi ne, %3, %c0_i32_1 : i32
    scf.if %4 {
      %cst = arith.constant 0xFF800000 : f32
      %11 = vector.broadcast %cst : f32 to vector<16x1xf32>
      %c0 = arith.constant 0 : index
      %c0_5 = arith.constant 0 : index
      %12 = vector.load %arg8[%c0, %c0_5] : memref<16x1xf32, #tpu.memory_space<vmem>>, vector<16x1xf32>
      tpu.vector_store %arg8[%c0, %c0_5], %11 {strides = array<i32>} : memref<16x1xf32, #tpu.memory_space<vmem>>, vector<16x1xf32>,
      %cst_6 = arith.constant 0.000000e+00 : f32
      %13 = vector.broadcast %cst_6 : f32 to vector<16x1xf32>
      %c0_7 = arith.constant 0 : index
      %c0_8 = arith.constant 0 : index
      %14 = vector.load %arg9[%c0_7, %c0_8] : memref<16x1xf32, #tpu.memory_space<vmem>>, vector<16x1xf32>
      tpu.vector_store %arg9[%c0_7, %c0_8], %13 {strides = array<i32>} : memref<16x1xf32, #tpu.memory_space<vmem>>, vector<16x1xf32>,
    } else {
    }
    %c0_i32_2 = arith.constant 0 : i32
    %5 = arith.cmpi eq, %arg1, %c0_i32_2 : i32
    %6 = arith.extui %5 : i1 to i32
    %c0_i32_3 = arith.constant 0 : i32
    %7 = arith.cmpi ne, %6, %c0_i32_3 : i32
    scf.if %7 {
      %c0 = arith.constant 0 : index
      %c0_5 = arith.constant 0 : index
      %11 = vector.load %arg3[%c0, %c0_5] : memref<16x32xbf16, #tpu.memory_space<vmem>>, vector<16x32xbf16>
      %c0_6 = arith.constant 0 : index
      %c0_7 = arith.constant 0 : index
      %12 = vector.load %arg4[%c0_6, %c0_7] : memref<32x128xbf16, #tpu.memory_space<vmem>>, vector<32x128xbf16>
      %cst = arith.constant dense<0.000000e+00> : vector<16x128xf32>
      %13 = tpu.matmul %11, %12, %cst {dimension_numbers = #tpu.dot_dimension_numbers<[1], [0], [0], [1], [0, 0, 1, 1], [], []>} : vector<16x32xbf16>, vector<32x128xbf16>, vector<16x128xf32> -> vector<16x128xf32>
      %c0_8 = arith.constant 0 : index
      %c0_9 = arith.constant 0 : index
      %14 = vector.load %arg5[%c0_8, %c0_9] : memref<1x128xf32, #tpu.memory_space<vmem>>, vector<1x128xf32>
      %15 = vector.broadcast %14 : vector<1x128xf32> to vector<16x128xf32>
      %16 = arith.addf %13, %15 : vector<16x128xf32>
      %17 = arith.index_cast %arg2 : i32 to index
      %c0_10 = arith.constant 0 : index
      %c0_11 = arith.constant 0 : index
      %18 = vector.load %arg7[%17, %c0_10, %c0_11] : memref<1x16x128xf32, #tpu.memory_space<vmem>>, vector<1x16x128xf32>
      %19 = vector.shape_cast %18 : vector<1x16x128xf32> to vector<16x128xf32>
      %20 = vector.shape_cast %16 : vector<16x128xf32> to vector<1x16x128xf32>
      tpu.vector_store %arg7[%17, %c0_10, %c0_11], %20 {strides = array<i32>} : memref<1x16x128xf32, #tpu.memory_space<vmem>>, vector<1x16x128xf32>,
      %c0_12 = arith.constant 0 : index
      %c0_13 = arith.constant 0 : index
      %21 = vector.load %arg8[%c0_12, %c0_13] : memref<16x1xf32, #tpu.memory_space<vmem>>, vector<16x1xf32>
      %cst_14 = arith.constant dense<0xFF800000> : vector<16xf32>
      %22 = vector.multi_reduction <maximumf>, %16, %cst_14 [1] : vector<16x128xf32> to vector<16xf32>
      %23 = vector.shape_cast %22 : vector<16xf32> to vector<16x1xf32>
      %24 = arith.maximumf %21, %23 : vector<16x1xf32>
      %c0_15 = arith.constant 0 : index
      %c0_16 = arith.constant 0 : index
      %25 = vector.load %arg9[%c0_15, %c0_16] : memref<16x1xf32, #tpu.memory_space<vmem>>, vector<16x1xf32>
      %26 = arith.subf %21, %24 : vector<16x1xf32>
      %27 = math.exp %26 : vector<16x1xf32>
      %28 = arith.mulf %25, %27 : vector<16x1xf32>
      %29 = vector.broadcast %24 : vector<16x1xf32> to vector<16x128xf32>
      %30 = arith.subf %16, %29 : vector<16x128xf32>
      %31 = math.exp %30 : vector<16x128xf32>
      %cst_17 = arith.constant dense<0.000000e+00> : vector<16xf32>
      %32 = vector.multi_reduction <add>, %31, %cst_17 [1] : vector<16x128xf32> to vector<16xf32>
      %33 = vector.shape_cast %32 : vector<16xf32> to vector<16x1xf32>
      %34 = arith.addf %28, %33 : vector<16x1xf32>
      %c0_18 = arith.constant 0 : index
      %c0_19 = arith.constant 0 : index
      %35 = vector.load %arg9[%c0_18, %c0_19] : memref<16x1xf32, #tpu.memory_space<vmem>>, vector<16x1xf32>
      tpu.vector_store %arg9[%c0_18, %c0_19], %34 {strides = array<i32>} : memref<16x1xf32, #tpu.memory_space<vmem>>, vector<16x1xf32>,
      %c0_20 = arith.constant 0 : index
      %c0_21 = arith.constant 0 : index
      %36 = vector.load %arg8[%c0_20, %c0_21] : memref<16x1xf32, #tpu.memory_space<vmem>>, vector<16x1xf32>
      tpu.vector_store %arg8[%c0_20, %c0_21], %24 {strides = array<i32>} : memref<16x1xf32, #tpu.memory_space<vmem>>, vector<16x1xf32>,
    } else {
    }
    %c1_i32 = arith.constant 1 : i32
    %8 = arith.cmpi eq, %arg1, %c1_i32 : i32
    %9 = arith.extui %8 : i1 to i32
    %c0_i32_4 = arith.constant 0 : i32
    %10 = arith.cmpi ne, %9, %c0_i32_4 : i32
    scf.if %10 {
      %c0 = arith.constant 0 : index
      %c0_5 = arith.constant 0 : index
      %11 = vector.load %arg8[%c0, %c0_5] : memref<16x1xf32, #tpu.memory_space<vmem>>, vector<16x1xf32>
      %c0_6 = arith.constant 0 : index
      %c0_7 = arith.constant 0 : index
      %12 = vector.load %arg9[%c0_6, %c0_7] : memref<16x1xf32, #tpu.memory_space<vmem>>, vector<16x1xf32>
      %13 = math.log %12 : vector<16x1xf32>
      %14 = arith.addf %11, %13 : vector<16x1xf32>
      %15 = arith.index_cast %arg2 : i32 to index
      %c0_8 = arith.constant 0 : index
      %c0_9 = arith.constant 0 : index
      %16 = vector.load %arg7[%15, %c0_8, %c0_9] : memref<1x16x128xf32, #tpu.memory_space<vmem>>, vector<1x16x128xf32>
      %17 = vector.shape_cast %16 : vector<1x16x128xf32> to vector<16x128xf32>
      %18 = vector.broadcast %14 : vector<16x1xf32> to vector<16x128xf32>
      %19 = arith.subf %17, %18 : vector<16x128xf32>
      %c0_10 = arith.constant 0 : index
      %c0_11 = arith.constant 0 : index
      %20 = vector.load %arg6[%c0_10, %c0_11] : memref<16x128xf32, #tpu.memory_space<vmem>>, vector<16x128xf32>
      tpu.vector_store %arg6[%c0_10, %c0_11], %19 {strides = array<i32>} : memref<16x128xf32, #tpu.memory_space<vmem>>, vector<16x128xf32>,
    } else {
    }
    return
  }
  func.func @transform_0(%arg0: i32, %arg1: i32, %arg2: i32) -> (i32, i32) {
    %c0_i32 = arith.constant 0 : i32
    %c0_i32_0 = arith.constant 0 : i32
    return %arg0, %c0_i32 : i32, i32
  }
  func.func @transform_1(%arg0: i32, %arg1: i32, %arg2: i32) -> (i32, i32) {
    %c1_i32 = arith.constant 1 : i32
    %0 = arith.subi %c1_i32, %arg1 : i32
    %1 = arith.muli %arg2, %0 : i32
    %c0_i32 = arith.constant 0 : i32
    %c0_i32_0 = arith.constant 0 : i32
    return %c0_i32, %1 : i32, i32
  }
  func.func @transform_2(%arg0: i32, %arg1: i32, %arg2: i32) -> (i32, i32) {
    %c1_i32 = arith.constant 1 : i32
    %0 = arith.subi %c1_i32, %arg1 : i32
    %1 = arith.muli %arg2, %0 : i32
    %c0_i32 = arith.constant 0 : i32
    %c0_i32_0 = arith.constant 0 : i32
    return %c0_i32, %1 : i32, i32
  }
  func.func @transform_3(%arg0: i32, %arg1: i32, %arg2: i32) -> (i32, i32) {
    %0 = arith.muli %arg2, %arg1 : i32
    %c0_i32 = arith.constant 0 : i32
    return %arg0, %0 : i32, i32
  }
}

</mosaic_0001>

<bundles_post_ra>
// kernel: tpu_custom_call.1
= control target key start
LH: loop header
LB: loop body
LE: loop exit
PB: predicated region body
PF: predicated region fallthrough
CT: control target
= control target key end

     0   :  { %8 = vsyncpa [#allocation6], 0  ;;  %s985_s0 = inlined_call_operand.hbm [shape: bf16[16,32], index: 0, kind: input, shape index: {}]   ;;  %s986_s1 = inlined_call_operand.hbm [shape: bf16[32,128], index: 1, kind: input, shape index: {}]   ;;  %s987_s2 = inlined_call_operand.vmem [shape: f32[1,128], index: 2, kind: input, shape index: {}]   ;;  %s988_s3 = inlined_call_operand.hbm [shape: f32[16,128], index: 3, kind: output, shape index: {}]  }
   0x1   :  { %9 = vsyncpa [#allocation9], 0 }
   0x2   :  { %11 = vsyncpa [#allocation9 + $0x1], 0 }
   0x3   :  { %12 = vsyncpa [#allocation7], 0 }
   0x4   :  { %14 = vsyncpa [#allocation7 + $0x1], 0  ;;  %s845_s12 = smov 0   ;;  %s847_s13 = smov 0  }
   0x5   :  { %s849_s14 = smov 0  }
   0x6 LB: > { %s573_s15 = sadd.s32 4294967295, %s810_s14   ;;  %s574_s16 = sadd.s32 4294967294, %s810_s14   ;;  %s810_s14 = sphi %s849_s14, %s20_s14   ;;  %s806_s13 = sphi %s847_s13, %s1003_s13   ;;  %s802_s12 = sphi %s845_s12, %s1002_s12  }
   0x7   : > { %s35_s17 = sadd.s32 1, %s806_s13  ;;  %p575_p0 = scmp.ge.s32.totalorder %s810_s14, 1 }
   0x8   : > { %p37_p1 = scmp.ge.s32.totalorder %s35_s17, 2  ;;  %p160_p2 = scmp.lt.s32.totalorder %s810_s14, 3 }
   0x9   : > { %p867_p3 = scmp.eq.s32.totalorder %s573_s15, 0  ;;  %s812_s20 = smov [#allocation5]  }
   0xa   : > { %s1005_s17 = smov (%p37_p1, %s35_s17), 0  ;;  %p873_p4 = pnand %p575_p0, %p160_p2 }
   0xb   : > { %s992_s18 = scalar_select %p867_p3, 1, 0 }
   0xc   : > { %s993_s19 = scalar_select %p873_p4, 1, 0 }
   0xd   : > { %s175_s21 = sshll.u32 %s812_s20, 4  ;;  %p619_p5 = pneg %p873_p4  ;;  %s176_s21 = int_to_ptr.vmem [resolvable:$true] %s175_s21 }
   0xe   : > { %s694_s25 = scalar_lea.hbm %s985_s0, 128 }
   0xf   : > { %p882_p7 = pnand %p867_p3, %p619_p5  ;;  %p695_p10 = scmp.ne.s32.totalorder %s985_s0, %s694_s25 }
  0x10   : > { %p701_p0 = scmp.lt.u32.totalorder %s694_s25, %s985_s0 }
  0x11   : > { %p696_p11 = pneg %p882_p7 }
  0x13   : > { %p697_p12 = pnand %p696_p11, %p695_p10 }
  0x15   : > { %p698_p13 = pneg %p697_p12 }
  0x17   : > { %p703_p1 = pnand %p701_p0, %p698_p13 }
  0x19   : > { %706 = shalt.err (!%p703_p1)
}
  0x1a   : > { %s707_s30 = scalar_lea.vmem %s176_s21, 128  ;;  %p715_p9 = scmp.lt.s32.totalorder %s176_s21, %s176_s21 }
  0x1b   : > { %p708_p2 = scmp.ne.s32.totalorder %s176_s21, %s707_s30  ;;  %p716_p8 = scmp.lt.s32.totalorder %s707_s30, %s707_s30 }
  0x1d   : > { %p710_p5 = pnand %p708_p2, %p696_p11  ;;  %p717_p3 = por %p716_p8, %p715_p9 }
  0x1f   : > { %p711_p6 = pneg %p710_p5 }
  0x21   : > { %p718_p4 = pnand %p717_p3, %p711_p6 }
  0x23   : > { %721 = shalt.err (!%p718_p4)
}
  0x24   : > { %s813_s4 = smov 64   ;;  %s814_s5 = smov 4  }
  0x25   : > { %622 = dma.hbm_to_vmem [thread:$0]  (!%p882_p7), %s985_s0, 128, %s176_s21, [#allocation6], %s813_s4, %s813_s4, %s814_s5  }
  0x26   : > { %s815_s8 = smov [#allocation8]   ;;  %p995_p10 = scmp.lt.s32.totalorder %s810_s14, 2 }
  0x27   : > { %s201_s9 = sshll.u32 %s815_s8, 4  ;;  %p996_p11 = scmp.eq.s32.totalorder %s810_s14, 0  ;;  %s202_s9 = int_to_ptr.vmem [resolvable:$true] %s201_s9 }
  0x28   : > { %s722_s23 = scalar_lea.hbm %s986_s1, 256 }
  0x29   : > { %p908_p12 = pnand %p996_p11, %p995_p10  ;;  %p723_p3 = scmp.ne.s32.totalorder %s986_s1, %s722_s23 }
  0x2a   : > { %p729_p8 = scmp.lt.u32.totalorder %s722_s23, %s986_s1 }
  0x2b   : > { %p724_p4 = pneg %p908_p12 }
  0x2d   : > { %p725_p6 = pnand %p724_p4, %p723_p3 }
  0x2f   : > { %p726_p7 = pneg %p725_p6 }
  0x31   : > { %p731_p9 = pnand %p729_p8, %p726_p7 }
  0x33   : > { %734 = shalt.err (!%p731_p9)
}
  0x34   : > { %s735_s26 = scalar_lea.vmem %s202_s9, 256  ;;  %s742_s27 = scalar_lea.vmem %s202_s9, 512 }
  0x35   : > { %p736_p13 = scmp.ne.s32.totalorder %s202_s9, %s735_s26  ;;  %p743_p2 = scmp.lt.s32.totalorder %s202_s9, %s202_s9 }
  0x36   : > { %p744_p5 = scmp.lt.s32.totalorder %s742_s27, %s735_s26 }
  0x37   : > { %p738_p0 = pnand %p736_p13, %p724_p4 }
  0x38   : > { %p745_p10 = por %p744_p5, %p743_p2 }
  0x39   : > { %p739_p1 = pneg %p738_p0 }
  0x3b   : > { %p746_p11 = pnand %p745_p10, %p739_p1 }
  0x3d   : > { %749 = shalt.err (!%p746_p11)
}
  0x3e   : > { %626 = dma.hbm_to_vmem [thread:$0]  (!%p908_p12), %s986_s1, 256, %s202_s9, [#allocation9], %s813_s4, %s813_s4, %s814_s5  }
  0x3f   : > { %p998_p3 = scmp.ne.s32.totalorder %s993_s19, 0 }
  0x40   : > { %p999_p6 = scmp.ne.s32.totalorder (!%p998_p3), %s992_s18, 0 }
  0x41   : > { %223 = sbr.rel (%p998_p3) target bundleno = 921 (0x399), region = 32 }
  0x48   : > { %789 = dma.done.wait (%p999_p6), [#allocation6], 128  }
  0x49   : > { %791 = vsyncadd (%p999_p6), [#allocation6], 4294967168 }
  0x4a   : > { %793 = dma.done.wait (%p999_p6), [#allocation9], 256  }
  0x4b   : > { %795 = vsyncadd (%p999_p6), [#allocation9], 4294967040  ;;  %p274_p4 = scmp.eq.s32.totalorder %s802_s12, 0 }
  0x4c   : > { %vm280_vm0 = vcmask (%p274_p4), 7168   ;;  %v816_v0 = vmov (%p274_p4), -inf   ;;  %v817_v1 = vmov (%p274_p4), 0.0  }
  0x4d   : > { %279 = sbr.rel (!%p274_p4) target bundleno = 84 (0x54), region = 44  ;;  %281 = vst.msk [vmem:[#allocation3] sm:$0xff] (%p274_p4), %vm280_vm0, %v816_v0  ;;  %282 = vst.msk [vmem:[#allocation3 + $0x8] sm:$0xff] (%p274_p4), %vm280_vm0, %v816_v0 }
  0x4e   : > { %283 = vst.msk [vmem:[#allocation4] sm:$0xff] (%p274_p4), %vm280_vm0, %v817_v1  ;;  %284 = vst.msk [vmem:[#allocation4 + $0x8] sm:$0xff] (%p274_p4), %vm280_vm0, %v817_v1 }
  0x54 PF: > { %p584_p12 = scmp.ne.s32.totalorder %s802_s12, 0 }
  0x55   : > { %v678_v2 = vld [vmem:[#allocation8] sm:$0xff] (!%p584_p12)   ;;  %v818_v3 = vmov (!%p584_p12), 0.0   ;;  %v679_v4 = vld [vmem:[#allocation8 + $0x8] sm:$0xff] (!%p584_p12)   ;;  %vm819_vm1 = vmmov (!%p584_p12), 0   ;;  %v680_v5 = vld [vmem:[#allocation5] sm:$0xff] (!%p584_p12)   ;;  %vm318_vm2 = vcmask (!%p584_p12), 261120  }
  0x56   : > { %287 = sbr.rel (%p584_p12) target bundleno = 744 (0x2e8), region = 48  ;;  %599 = vmatprep.subr.bf16.mxu0 (!%p584_p12), %v818_v3  ;;  %603 = vmatprep.mubr.msk.bf16.mxu0 (!%p584_p12), %vm819_vm1, %v818_v3  ;;  %v585_v6 = vld [vmem:[%s987_s2] ss:$0 sm:$0xff] (!%p584_p12)  ;;  %v820_v13 = vmov (!%p584_p12), 0   ;;  %v367_v14 = vld [vmem:[#allocation3] sm:$0xff] (!%p584_p12)  ;;  %vm407_vm3 = vcmask (!%p584_p12), 7168  }
  0x57   : > { %600 = vmatpush3.bf16.msra.mxu0 (!%p584_p12), %v678_v2  ;;  %676 = vset.pattern.permute.xlu1 (!%p584_p12), %v820_v13  ;;  %v368_v17 = vld [vmem:[#allocation3 + $0x8] sm:$0xff] (!%p584_p12)  ;;  %v375_v33 = vld [vmem:[#allocation4] sm:$0xff] (!%p584_p12)  ;;  %v376_v37 = vld [vmem:[#allocation4 + $0x8] sm:$0xff] (!%p584_p12) }
  0x58   : > { %601 = vmatprep.subr.bf16.mxu0 (!%p584_p12), %v818_v3  ;;  %677 = vset.pattern.permute.xlu0 (!%p584_p12), %v820_v13 }
  0x5b   : > { %602 = vmatpush3.bf16.msra.mxu0 (!%p584_p12), %v679_v4 }
  0x5e   : > { %604 = vmatmul.mubr.msk.bf16.vlgmr.msra.gmra.mrb[0].mxu0 %vm318_vm2, %v680_v5 }
 0x131   : > { %v356_v7 = vpop.f32.mrb[0].mxu0 }
 0x132   : > { %v357_v8 = vadd.f32 %v585_v6, %v356_v7  ;;  %v605_v9 = vpop.f32.mrb[1].mxu0 }
 0x133   : > { %v359_v10 = vpop.f32.mrb[2].mxu0 }
 0x134   : > { %365 = vst [vmem:[#allocation2] sm:$0xff] %v357_v8  ;;  %v360_v11 = vadd.f32 %v585_v6, %v359_v10  ;;  %369 = vmax.xlane.f32.xlu0 %v357_v8  ;;  %v606_v12 = vpop.f32.mrb[3].mxu0 }
 0x136   : > { %366 = vst [vmem:[#allocation2 + $0x8] sm:$0xff] %v360_v11 }
 0x138   : > { %371 = vmax.xlane.f32.xlu0 %v360_v11 }
 0x1c1   : > { %v370_v15 = vpop.xlane.xlu0 %369 }
 0x1c2   : > { %v373_v16 = vmax.f32 %v367_v14, %v370_v15 }
 0x1c4   : > { %v377_v18 = vsub.f32 %v367_v14, %v373_v16  ;;  %410 = vst.msk [vmem:[#allocation3] sm:$0xff] %vm407_vm3, %v373_v16  ;;  %387 = vperm.xlu1 %676, %v373_v16  }
 0x1c5   : > { %v372_v19 = vpop.xlane.xlu0 %371 }
 0x1c6   : > { %v374_v20 = vmax.f32 %v368_v17, %v372_v19  ;;  %v379_v30 = vmul.f32 1.442695, %v377_v18 }
 0x1c8   : > { %v378_v21 = vsub.f32 %v368_v17, %v374_v20  ;;  %411 = vst.msk [vmem:[#allocation3 + $0x8] sm:$0xff] %vm407_vm3, %v374_v20  ;;  %392 = vperm.xlu1 %676, %v374_v20  }
 0x1ca   : > { %v381_v31 = vmul.f32 1.442695, %v378_v21 }
 0x243   : > { %v388_v22 = vpop.permute.xlu1 %387 }
 0x244   : > { %v395_v23 = vsub.f32 %v357_v8, %v388_v22 }
 0x246   : > { %v397_v24 = vmul.f32 1.442695, %v395_v23 }
 0x247   : > { %v393_v25 = vpop.permute.xlu1 %392 }
 0x248   : > { %681 = vpow2.f32 %v397_v24  ;;  %v396_v26 = vsub.f32 %v360_v11, %v393_v25 }
 0x24a   : > { %v399_v27 = vmul.f32 1.442695, %v396_v26 }
 0x24c   : > { %683 = vpow2.f32 %v399_v27 }
 0x24d   : > { %685 = vpow2.f32 %v379_v30 }
 0x24e   : > { %687 = vpow2.f32 %v381_v31 }
 0x252   : > { %v682_v28 = vpop.eup %681 }
 0x253   : > { %401 = vadd.xlane.f32.xlu0 %v682_v28 }
 0x256   : > { %v684_v29 = vpop.eup %683 }
 0x257   : > { %403 = vadd.xlane.f32.xlu1 %v684_v29  ;;  %v686_v32 = vpop.eup %685 }
 0x258   : > { %v383_v34 = vmul.f32 %v686_v32, %v375_v33  ;;  %v688_v35 = vpop.eup %687 }
 0x259   : > { %v384_v39 = vmul.f32 %v688_v35, %v376_v37 }
 0x2e0   : > { %v402_v36 = vpop.xlane.xlu0 %401 }
 0x2e1   : > { %v405_v38 = vadd.f32 %v402_v36, %v383_v34 }
 0x2e3   : > { %408 = vst.msk [vmem:[#allocation4] sm:$0xff] %vm407_vm3, %v405_v38 }
 0x2e4   : > { %v404_v40 = vpop.xlane.xlu1 %403 }
 0x2e5   : > { %v406_v41 = vadd.f32 %v404_v40, %v384_v39 }
 0x2e7   : > { %409 = vst.msk [vmem:[#allocation4 + $0x8] sm:$0xff] %vm407_vm3, %v406_v41 }
 0x2e8 PF: > { %p590_p7 = scmp.ne.s32.totalorder %s802_s12, 1 }
 0x2e9   : > { %v821_v43 = vmov (!%p590_p7), 0   ;;  %v416_v46 = vld [vmem:[#allocation3] sm:$0xff] (!%p590_p7)  ;;  %v417_v49 = vld [vmem:[#allocation3 + $0x8] sm:$0xff] (!%p590_p7)  ;;  %v428_v53 = vld [vmem:[#allocation2] sm:$0xff] (!%p590_p7) }
 0x2ea   : > { %415 = sbr.rel (%p590_p7) target bundleno = 897 (0x381), region = 52  ;;  %v418_v42 = vld [vmem:[#allocation4] sm:$0xff] (!%p590_p7)  ;;  %689 = vset.pattern.permute.xlu0 (!%p590_p7), %v821_v43  ;;  %v429_v56 = vld [vmem:[#allocation2 + $0x8] sm:$0xff] (!%p590_p7) }
 0x2eb   : > { %690 = vlog2.f32 (!%p590_p7), %v418_v42 }
 0x2ee   : > { %v419_v44 = vld [vmem:[#allocation4 + $0x8] sm:$0xff] (!%p590_p7) }
 0x2ef   : > { %692 = vlog2.f32 (!%p590_p7), %v419_v44 }
 0x2f5   : > { %v691_v45 = vpop.eup %690 }
 0x2f6   : > { %v421_v48 = vmul.f32 0.6931472, %v691_v45 }
 0x2f8   : > { %v424_v51 = vadd.f32 %v421_v48, %v416_v46 }
 0x2f9   : > { %v693_v47 = vpop.eup %692 }
 0x2fa   : > { %v423_v50 = vmul.f32 0.6931472, %v693_v47  ;;  %432 = vperm.xlu0 %689, %v424_v51  }
 0x2fc   : > { %v425_v52 = vadd.f32 %v423_v50, %v417_v49 }
 0x2fe   : > { %437 = vperm.xlu0 %689, %v425_v52  }
 0x379   : > { %v433_v54 = vpop.permute.xlu0 %432 }
 0x37a   : > { %v440_v55 = vsub.f32 %v428_v53, %v433_v54 }
 0x37c   : > { %442 = vst [vmem:[#allocation10] sm:$0xff] %v440_v55 }
 0x37d   : > { %v438_v57 = vpop.permute.xlu0 %437 }
 0x37e   : > { %v441_v58 = vsub.f32 %v429_v56, %v438_v57 }
 0x380   : > { %443 = vst [vmem:[#allocation10 + $0x8] sm:$0xff] %v441_v58 }
 0x381 PF: > { %p950_p8 = scmp.eq.s32.totalorder %s573_s15, 1  ;;  %s822_s30 = smov [#allocation10]  }
 0x382   : > { %s460_s4 = sshll.u32 %s822_s30, 4  ;;  %s461_s4 = int_to_ptr.vmem [resolvable:$true] %s460_s4 }
 0x383   : > { %s750_s5 = scalar_lea.vmem %s461_s4, 256  ;;  %s756_s6 = scalar_lea.vmem %s461_s4, 512 }
 0x384   : > { %p751_p9 = scmp.ne.s32.totalorder %s461_s4, %s750_s5  ;;  %p757_p1 = scmp.lt.s32.totalorder %s461_s4, %s461_s4 }
 0x385   : > { %p758_p2 = scmp.lt.s32.totalorder %s756_s6, %s750_s5 }
 0x386   : > { %p752_p13 = pnand %p751_p9, %p950_p8 }
 0x387   : > { %p759_p5 = por %p758_p2, %p757_p1 }
 0x388   : > { %p753_p0 = pneg %p752_p13 }
 0x38a   : > { %p760_p10 = pnand %p759_p5, %p753_p0 }
 0x38c   : > { %763 = shalt.err (!%p760_p10)
}
 0x38d   : > { %s764_s8 = scalar_lea.hbm %s988_s3, 256 }
 0x38e   : > { %p765_p11 = scmp.ne.s32.totalorder %s988_s3, %s764_s8  ;;  %p770_p4 = scmp.lt.u32.totalorder %s764_s8, %s988_s3 }
 0x390   : > { %p766_p3 = pnand %p765_p11, %p950_p8 }
 0x392   : > { %p767_p6 = pneg %p766_p3 }
 0x394   : > { %p772_p12 = pnand %p770_p4, %p767_p6 }
 0x396   : > { %775 = shalt.err (!%p772_p12)
}
 0x397   : > { %s823_s23 = smov 128   ;;  %s824_s24 = smov 8  }
 0x398   : > { %616 = dma.vmem_to_hbm [thread:$0]  (%p950_p8), %s461_s4, 256, %s988_s3, [#allocation7], %s823_s23, %s823_s23, %s824_s24  }
 0x399 PF: > { %p638_p7 = scmp.eq.s32.totalorder %s574_s16, 1  ;;  %p1001_p9 = scmp.ge.s32.totalorder %s810_s14, 2 }
 0x39b   : > { %p628_p13 = pnand %p638_p7, %p1001_p9 }
 0x39d   : > { %797 = dma.done.wait (!%p628_p13), [#allocation7], 256  }
 0x39e   : > { %799 = vsyncadd (!%p628_p13), [#allocation7], 4294967040  ;;  %s20_s14 = sadd.s32 1, %s810_s14   ;;  %s1002_s12 = smov %s806_s13 }
 0x39f   : > { %p17_p0 = scmp.ge.s32.totalorder %s20_s14, 4   ;;  %s1003_s13 = smov %s1005_s17 }
 0x3a1   :  { %19 = sbr.rel (!%p17_p0) target bundleno = 6 (0x6), region = 100 }
 0x3a8   :  { %481 = vsyncpa [#allocation6], 1 }
 0x3a9   :  { %483 = vsyncpa [#allocation6 + $0x1], 1 }
 0x3aa   :  { %484 = vsyncpa [#allocation9], 1 }
 0x3ab   :  { %486 = vsyncpa [#allocation9 + $0x1], 1 }
 0x3ac   :  { %487 = vsyncpa [#allocation7], 1 }
 0x3ad   :  { %489 = vsyncpa [#allocation7 + $0x1], 1 }

</bundles_post_ra>
